<compile_context>
chip_gen: v5e
topology: v5e:2x2
jax: 0.10.0
libtpu: 0.0.40
codegen_flags: <defaults>
</compile_context>

<pallas_src>
import functools

import jax
import jax.numpy as jnp
from jax import lax
from jax.experimental import pallas as pl
from jax.experimental.pallas import tpu as pltpu


def decoder_kernel(xf_ref, wih_ref, whh_ref, b_ref, wlin_ref, blin_ref,
                   out_ref, cn_ref, sm_ref):
    """Unrolled LSTM + final-hidden Linear + Softmax, everything in VMEM.

    xf_ref   : (T*Bp, I)  time-major flattened input (row t*Bp + b); Bp = batch
                          padded to a multiple of 8 sublanes
    wih_ref  : (I, 4H)    W_ih^T, gate order [i, f, o, g]
    whh_ref  : (H, 4H)    W_hh^T, gate order [i, f, o, g]
    b_ref    : (1, 4H)    b_ih + b_hh, gate order [i, f, o, g]
    wlin_ref : (H, 2)     linear weight^T
    blin_ref : (1, 2)     linear bias
    out_ref  : (Bp, T*H)  per-step hidden states, lane-dense ([h_0|h_1|...])
    cn_ref   : (Bp, H)    final cell state c_n
    sm_ref   : (Bp, 2)    softmax(linear(h_n))
    """
    H = whh_ref.shape[0]
    Bp = out_ref.shape[0]
    T = xf_ref.shape[0] // Bp

    # Hoist all weights into locals once — no per-iteration Ref reloads.
    wih = wih_ref[...]
    whh = whh_ref[...]
    b = b_ref[...]

    # Hoist the input projection (+ bias) out of the recurrence: one
    # (T*Bp, I) x (I, 4H) MXU call instead of T tiny matmuls + T broadcast
    # bias adds on the serial path.
    gates_x = jnp.dot(xf_ref[...], wih, preferred_element_type=jnp.float32) + b

    h = jnp.zeros((Bp, H), jnp.float32)
    c = jnp.zeros((Bp, H), jnp.float32)
    hs = []
    # T is a compile-time constant and Bp == 8k, so every slice below is a
    # static, sublane-tile-aligned full-vreg block (no per-step sublane
    # shuffles / masked selects).
    # TODO(synk): keep W_hh resident across the recurrence via
    # pltpu.matmul_push_rhs / matmul_acc_lhs / matmul_pop (MRB-seeded
    # accumulation on v7x) once a bundle dump confirms the per-step weight
    # push is on the critical path; and switch this unroll to lax.fori_loop
    # with pl.ds stores before T grows large.
    for t in range(T):
        gates = gates_x[t * Bp:(t + 1) * Bp, :] + jnp.dot(
            h, whh, preferred_element_type=jnp.float32)
        sig = jax.nn.sigmoid(gates[:, :3 * H])        # fused i, f, o gates
        i_g = sig[:, 0 * H:1 * H]
        f_g = sig[:, 1 * H:2 * H]
        o_g = sig[:, 2 * H:3 * H]
        g_g = jnp.tanh(gates[:, 3 * H:])              # g gate
        c = f_g * c + i_g * g_g
        h = o_g * jnp.tanh(c)
        hs.append(h)

    # Single lane-dense (Bp, T*H) store of all per-step hidden states instead
    # of T masked narrow stores at dynamic offsets.
    out_ref[...] = jnp.concatenate(hs, axis=1)
    cn_ref[...] = c

    # Linear on h_n, then softmax over the class dim (PyTorch nn.Softmax() on
    # 2-D input defaults to dim=1).  Exact divide: numerics must match ref.
    # NOTE: default MXU precision (bf16 passes) matches the XLA reference at
    # 1e-5 for these short contractions; add precision=HIGHEST on the dots if
    # exact float32 parity with PyTorch CPU is required.
    logits = (jnp.dot(h, wlin_ref[...], preferred_element_type=jnp.float32)
              + blin_ref[...])
    m = jnp.max(logits, axis=-1, keepdims=True)
    e = jnp.exp(logits - m)
    sm_ref[...] = e / jnp.sum(e, axis=-1, keepdims=True)


def _reorder_gates(w):
    """PyTorch gate order (i, f, g, o) -> kernel order (i, f, o, g) along axis 0."""
    i, f, g, o = jnp.split(w, 4, axis=0)
    return jnp.concatenate([i, f, o, g], axis=0)


def pack_decoder_params(params):
    """One-time parameter re-pack (gate reorder, transposes, bias sum).

    Call once outside the hot path; decoder_forward then only touches the
    packed arrays, so no per-call transpose/reorder XLA ops remain.
    """
    H = params["w_hh"].shape[1]
    return {
        "wih_t": _reorder_gates(params["w_ih"]).T,                      # (I, 4H)
        "whh_t": _reorder_gates(params["w_hh"]).T,                      # (H, 4H)
        "b": _reorder_gates(params["b_ih"] + params["b_hh"]).reshape(1, 4 * H),
        "wlin_t": params["w_lin"].T,                                    # (H, 2)
        "blin": params["b_lin"].reshape(1, 2),
    }


@jax.jit
def decoder_forward(x, packed, hidden=None):
    """Mirrors Decoder.forward: returns (output, softmax, (h_n, c_n)).

    `hidden` is ignored, matching the PyTorch module (LSTM is called without it).
    The whole wrapper is jitted so the x pad/transpose/flatten and the output
    slices fuse into a handful of XLA ops around a single pallas_call.
    """
    del hidden
    x = x.astype(jnp.float32)
    B, T, I = x.shape
    H = packed["whh_t"].shape[0]
    Bp = ((B + 7) // 8) * 8            # pad batch to a full 8-row sublane tile

    # Batch-pad + time-major flatten so step t reads a tile-aligned row block.
    x_p = jnp.pad(x, ((0, Bp - B), (0, 0), (0, 0)))
    xf = jnp.transpose(x_p, (1, 0, 2)).reshape(T * Bp, I)

    vmem = functools.partial(pl.BlockSpec, memory_space=pltpu.MemorySpace.VMEM)
    out_shapes = (
        jax.ShapeDtypeStruct((Bp, T * H), jnp.float32),   # LSTM output (lane-dense)
        jax.ShapeDtypeStruct((Bp, H), jnp.float32),       # c_n
        jax.ShapeDtypeStruct((Bp, 2), jnp.float32),       # softmax
    )
    # TODO(synk): if B/T/H scale up, add a "parallel" batch grid (to use both
    # v7x TensorCores) and re-budget BlockSpec tiles against v7x's 64 MiB VMEM.
    out_flat, cn, sm = pl.pallas_call(
        decoder_kernel,
        out_shape=out_shapes,
        in_specs=[vmem() for _ in range(6)],
        out_specs=tuple(vmem() for _ in range(3)),
    )(xf, packed["wih_t"], packed["whh_t"], packed["b"],
      packed["wlin_t"], packed["blin"])

    out = out_flat[:B].reshape(B, T, H)
    hn = out_flat[:B, (T - 1) * H:]                       # h_n == last step of out
    # Match PyTorch (num_layers, B, H) layout for the returned hidden state.
    hidden_state = (hn.reshape(1, B, H), cn[:B].reshape(1, B, H))
    return out, sm[:B], hidden_state


def decoder_ref(x, params):
    """Pure-JAX reference (semantics of the PyTorch module) for validation."""
    x = x.astype(jnp.float32)
    B, T, I = x.shape
    H = params["w_hh"].shape[1]
    wih_t = params["w_ih"].T
    whh_t = params["w_hh"].T
    b = params["b_ih"] + params["b_hh"]

    def step(carry, x_t):
        h, c = carry
        gates = x_t @ wih_t + h @ whh_t + b
        i, f, g, o = jnp.split(gates, 4, axis=-1)
        i = jax.nn.sigmoid(i)
        f = jax.nn.sigmoid(f)
        g = jnp.tanh(g)
        o = jax.nn.sigmoid(o)
        c = f * c + i * g
        h = o * jnp.tanh(c)
        return (h, c), h

    init = (jnp.zeros((B, H), jnp.float32), jnp.zeros((B, H), jnp.float32))
    (h_fin, c_fin), outs = lax.scan(step, init, jnp.swapaxes(x, 0, 1))
    out = jnp.swapaxes(outs, 0, 1)
    logits = h_fin @ params["w_lin"].T + params["b_lin"]
    sm = jax.nn.softmax(logits, axis=-1)
    return out, sm, h_fin, c_fin


if __name__ == "__main__":
    B, T, I, H = 2, 8, 16, 32   # batch, seq, input_size, hidden_size

    key = jax.random.PRNGKey(0)
    keys = jax.random.split(key, 8)
    scale = 1.0 / jnp.sqrt(jnp.float32(H))
    uni = lambda k, shape: jax.random.uniform(k, shape, jnp.float32, -scale, scale)
    params = {
        "w_ih": uni(keys[0], (4 * H, I)),
        "w_hh": uni(keys[1], (4 * H, H)),
        "b_ih": uni(keys[2], (4 * H,)),
        "b_hh": uni(keys[3], (4 * H,)),
        "w_lin": uni(keys[4], (2, H)),
        "b_lin": uni(keys[5], (2,)),
    }
    x = jax.random.normal(keys[6], (B, T, I), jnp.float32)
    hidden = (jnp.zeros((1, B, H), jnp.float32), jnp.zeros((1, B, H), jnp.float32))

    packed = pack_decoder_params(params)   # one-time, outside the hot path
    out, sm, (hn, cn) = decoder_forward(x, packed, hidden)
    jax.block_until_ready((out, sm, hn, cn))

    # validate against the pure-JAX reference
    out_r, sm_r, hn_r, cn_r = decoder_ref(x, params)
    assert jnp.allclose(out, out_r, atol=1e-5, rtol=1e-5)
    assert jnp.allclose(sm, sm_r, atol=1e-5, rtol=1e-5)
    assert jnp.allclose(hn[0], hn_r, atol=1e-5, rtol=1e-5)
    assert jnp.allclose(cn[0], cn_r, atol=1e-5, rtol=1e-5)

    print("KERNEL_OK")
</pallas_src>

<mosaic_0001>
module attributes {stable_mosaic.version = 11 : i64} {
  func.func @decoder_kernel(%arg0: memref<64x16xf32, #tpu.memory_space<vmem>>, %arg1: memref<16x128xf32, #tpu.memory_space<vmem>>, %arg2: memref<32x128xf32, #tpu.memory_space<vmem>>, %arg3: memref<1x128xf32, #tpu.memory_space<vmem>>, %arg4: memref<32x2xf32, #tpu.memory_space<vmem>>, %arg5: memref<1x2xf32, #tpu.memory_space<vmem>>, %arg6: memref<8x256xf32, #tpu.memory_space<vmem>>, %arg7: memref<8x32xf32, #tpu.memory_space<vmem>>, %arg8: memref<8x2xf32, #tpu.memory_space<vmem>>) attributes {dimension_semantics = [], scalar_prefetch = 0 : i64, scratch_operands = 0 : i64, tpu.core_type = #tpu.core_type<tc>} {
    %c0 = arith.constant 0 : index
    %c0_0 = arith.constant 0 : index
    %0 = vector.load %arg1[%c0, %c0_0] : memref<16x128xf32, #tpu.memory_space<vmem>>, vector<16x128xf32>
    %c0_1 = arith.constant 0 : index
    %c0_2 = arith.constant 0 : index
    %1 = vector.load %arg2[%c0_1, %c0_2] : memref<32x128xf32, #tpu.memory_space<vmem>>, vector<32x128xf32>
    %c0_3 = arith.constant 0 : index
    %c0_4 = arith.constant 0 : index
    %2 = vector.load %arg3[%c0_3, %c0_4] : memref<1x128xf32, #tpu.memory_space<vmem>>, vector<1x128xf32>
    %c0_5 = arith.constant 0 : index
    %c0_6 = arith.constant 0 : index
    %3 = vector.load %arg0[%c0_5, %c0_6] : memref<64x16xf32, #tpu.memory_space<vmem>>, vector<64x16xf32>
    %cst = arith.constant dense<0.000000e+00> : vector<64x128xf32>
    %4 = tpu.matmul %3, %0, %cst {dimension_numbers = #tpu.dot_dimension_numbers<[1], [0], [0], [1], [0, 0, 1, 1], [], []>} : vector<64x16xf32>, vector<16x128xf32>, vector<64x128xf32> -> vector<64x128xf32>
    %5 = vector.broadcast %2 : vector<1x128xf32> to vector<64x128xf32>
    %6 = arith.addf %4, %5 : vector<64x128xf32>
    %cst_7 = arith.constant 0.000000e+00 : f32
    %7 = vector.broadcast %cst_7 : f32 to vector<8x32xf32>
    %cst_8 = arith.constant 0.000000e+00 : f32
    %8 = vector.broadcast %cst_8 : f32 to vector<8x32xf32>
    %9 = vector.extract_strided_slice %6 {offsets = [0, 0], sizes = [8, 128], strides = [1, 1]} : vector<64x128xf32> to vector<8x128xf32>
    %cst_9 = arith.constant dense<0.000000e+00> : vector<8x128xf32>
    %10 = tpu.matmul %7, %1, %cst_9 {dimension_numbers = #tpu.dot_dimension_numbers<[1], [0], [0], [1], [0, 0, 1, 1], [], []>} : vector<8x32xf32>, vector<32x128xf32>, vector<8x128xf32> -> vector<8x128xf32>
    %11 = arith.addf %9, %10 : vector<8x128xf32>
    %12 = vector.extract_strided_slice %11 {offsets = [0, 0], sizes = [8, 96], strides = [1, 1]} : vector<8x128xf32> to vector<8x96xf32>
    %13 = arith.negf %12 : vector<8x96xf32>
    %14 = math.exp %13 : vector<8x96xf32>
    %cst_10 = arith.constant 1.000000e+00 : f32
    %15 = vector.broadcast %cst_10 : f32 to vector<8x96xf32>
    %16 = arith.addf %15, %14 : vector<8x96xf32>
    %17 = arith.divf %15, %16 : vector<8x96xf32>
    %18 = vector.extract_strided_slice %17 {offsets = [0, 0], sizes = [8, 32], strides = [1, 1]} : vector<8x96xf32> to vector<8x32xf32>
    %19 = vector.extract_strided_slice %17 {offsets = [0, 32], sizes = [8, 32], strides = [1, 1]} : vector<8x96xf32> to vector<8x32xf32>
    %20 = vector.extract_strided_slice %17 {offsets = [0, 64], sizes = [8, 32], strides = [1, 1]} : vector<8x96xf32> to vector<8x32xf32>
    %21 = vector.extract_strided_slice %11 {offsets = [0, 96], sizes = [8, 32], strides = [1, 1]} : vector<8x128xf32> to vector<8x32xf32>
    %22 = math.tanh %21 : vector<8x32xf32>
    %23 = arith.mulf %19, %8 : vector<8x32xf32>
    %24 = arith.mulf %18, %22 : vector<8x32xf32>
    %25 = arith.addf %23, %24 : vector<8x32xf32>
    %26 = math.tanh %25 : vector<8x32xf32>
    %27 = arith.mulf %20, %26 : vector<8x32xf32>
    %28 = vector.extract_strided_slice %6 {offsets = [8, 0], sizes = [8, 128], strides = [1, 1]} : vector<64x128xf32> to vector<8x128xf32>
    %cst_11 = arith.constant dense<0.000000e+00> : vector<8x128xf32>
    %29 = tpu.matmul %27, %1, %cst_11 {dimension_numbers = #tpu.dot_dimension_numbers<[1], [0], [0], [1], [0, 0, 1, 1], [], []>} : vector<8x32xf32>, vector<32x128xf32>, vector<8x128xf32> -> vector<8x128xf32>
    %30 = arith.addf %28, %29 : vector<8x128xf32>
    %31 = vector.extract_strided_slice %30 {offsets = [0, 0], sizes = [8, 96], strides = [1, 1]} : vector<8x128xf32> to vector<8x96xf32>
    %32 = arith.negf %31 : vector<8x96xf32>
    %33 = math.exp %32 : vector<8x96xf32>
    %cst_12 = arith.constant 1.000000e+00 : f32
    %34 = vector.broadcast %cst_12 : f32 to vector<8x96xf32>
    %35 = arith.addf %34, %33 : vector<8x96xf32>
    %36 = arith.divf %34, %35 : vector<8x96xf32>
    %37 = vector.extract_strided_slice %36 {offsets = [0, 0], sizes = [8, 32], strides = [1, 1]} : vector<8x96xf32> to vector<8x32xf32>
    %38 = vector.extract_strided_slice %36 {offsets = [0, 32], sizes = [8, 32], strides = [1, 1]} : vector<8x96xf32> to vector<8x32xf32>
    %39 = vector.extract_strided_slice %36 {offsets = [0, 64], sizes = [8, 32], strides = [1, 1]} : vector<8x96xf32> to vector<8x32xf32>
    %40 = vector.extract_strided_slice %30 {offsets = [0, 96], sizes = [8, 32], strides = [1, 1]} : vector<8x128xf32> to vector<8x32xf32>
    %41 = math.tanh %40 : vector<8x32xf32>
    %42 = arith.mulf %38, %25 : vector<8x32xf32>
    %43 = arith.mulf %37, %41 : vector<8x32xf32>
    %44 = arith.addf %42, %43 : vector<8x32xf32>
    %45 = math.tanh %44 : vector<8x32xf32>
    %46 = arith.mulf %39, %45 : vector<8x32xf32>
    %47 = vector.extract_strided_slice %6 {offsets = [16, 0], sizes = [8, 128], strides = [1, 1]} : vector<64x128xf32> to vector<8x128xf32>
    %cst_13 = arith.constant dense<0.000000e+00> : vector<8x128xf32>
    %48 = tpu.matmul %46, %1, %cst_13 {dimension_numbers = #tpu.dot_dimension_numbers<[1], [0], [0], [1], [0, 0, 1, 1], [], []>} : vector<8x32xf32>, vector<32x128xf32>, vector<8x128xf32> -> vector<8x128xf32>
    %49 = arith.addf %47, %48 : vector<8x128xf32>
    %50 = vector.extract_strided_slice %49 {offsets = [0, 0], sizes = [8, 96], strides = [1, 1]} : vector<8x128xf32> to vector<8x96xf32>
    %51 = arith.negf %50 : vector<8x96xf32>
    %52 = math.exp %51 : vector<8x96xf32>
    %cst_14 = arith.constant 1.000000e+00 : f32
    %53 = vector.broadcast %cst_14 : f32 to vector<8x96xf32>
    %54 = arith.addf %53, %52 : vector<8x96xf32>
    %55 = arith.divf %53, %54 : vector<8x96xf32>
    %56 = vector.extract_strided_slice %55 {offsets = [0, 0], sizes = [8, 32], strides = [1, 1]} : vector<8x96xf32> to vector<8x32xf32>
    %57 = vector.extract_strided_slice %55 {offsets = [0, 32], sizes = [8, 32], strides = [1, 1]} : vector<8x96xf32> to vector<8x32xf32>
    %58 = vector.extract_strided_slice %55 {offsets = [0, 64], sizes = [8, 32], strides = [1, 1]} : vector<8x96xf32> to vector<8x32xf32>
    %59 = vector.extract_strided_slice %49 {offsets = [0, 96], sizes = [8, 32], strides = [1, 1]} : vector<8x128xf32> to vector<8x32xf32>
    %60 = math.tanh %59 : vector<8x32xf32>
    %61 = arith.mulf %57, %44 : vector<8x32xf32>
    %62 = arith.mulf %56, %60 : vector<8x32xf32>
    %63 = arith.addf %61, %62 : vector<8x32xf32>
    %64 = math.tanh %63 : vector<8x32xf32>
    %65 = arith.mulf %58, %64 : vector<8x32xf32>
    %66 = vector.extract_strided_slice %6 {offsets = [24, 0], sizes = [8, 128], strides = [1, 1]} : vector<64x128xf32> to vector<8x128xf32>
    %cst_15 = arith.constant dense<0.000000e+00> : vector<8x128xf32>
    %67 = tpu.matmul %65, %1, %cst_15 {dimension_numbers = #tpu.dot_dimension_numbers<[1], [0], [0], [1], [0, 0, 1, 1], [], []>} : vector<8x32xf32>, vector<32x128xf32>, vector<8x128xf32> -> vector<8x128xf32>
    %68 = arith.addf %66, %67 : vector<8x128xf32>
    %69 = vector.extract_strided_slice %68 {offsets = [0, 0], sizes = [8, 96], strides = [1, 1]} : vector<8x128xf32> to vector<8x96xf32>
    %70 = arith.negf %69 : vector<8x96xf32>
    %71 = math.exp %70 : vector<8x96xf32>
    %cst_16 = arith.constant 1.000000e+00 : f32
    %72 = vector.broadcast %cst_16 : f32 to vector<8x96xf32>
    %73 = arith.addf %72, %71 : vector<8x96xf32>
    %74 = arith.divf %72, %73 : vector<8x96xf32>
    %75 = vector.extract_strided_slice %74 {offsets = [0, 0], sizes = [8, 32], strides = [1, 1]} : vector<8x96xf32> to vector<8x32xf32>
    %76 = vector.extract_strided_slice %74 {offsets = [0, 32], sizes = [8, 32], strides = [1, 1]} : vector<8x96xf32> to vector<8x32xf32>
    %77 = vector.extract_strided_slice %74 {offsets = [0, 64], sizes = [8, 32], strides = [1, 1]} : vector<8x96xf32> to vector<8x32xf32>
    %78 = vector.extract_strided_slice %68 {offsets = [0, 96], sizes = [8, 32], strides = [1, 1]} : vector<8x128xf32> to vector<8x32xf32>
    %79 = math.tanh %78 : vector<8x32xf32>
    %80 = arith.mulf %76, %63 : vector<8x32xf32>
    %81 = arith.mulf %75, %79 : vector<8x32xf32>
    %82 = arith.addf %80, %81 : vector<8x32xf32>
    %83 = math.tanh %82 : vector<8x32xf32>
    %84 = arith.mulf %77, %83 : vector<8x32xf32>
    %85 = vector.extract_strided_slice %6 {offsets = [32, 0], sizes = [8, 128], strides = [1, 1]} : vector<64x128xf32> to vector<8x128xf32>
    %cst_17 = arith.constant dense<0.000000e+00> : vector<8x128xf32>
    %86 = tpu.matmul %84, %1, %cst_17 {dimension_numbers = #tpu.dot_dimension_numbers<[1], [0], [0], [1], [0, 0, 1, 1], [], []>} : vector<8x32xf32>, vector<32x128xf32>, vector<8x128xf32> -> vector<8x128xf32>
    %87 = arith.addf %85, %86 : vector<8x128xf32>
    %88 = vector.extract_strided_slice %87 {offsets = [0, 0], sizes = [8, 96], strides = [1, 1]} : vector<8x128xf32> to vector<8x96xf32>
    %89 = arith.negf %88 : vector<8x96xf32>
    %90 = math.exp %89 : vector<8x96xf32>
    %cst_18 = arith.constant 1.000000e+00 : f32
    %91 = vector.broadcast %cst_18 : f32 to vector<8x96xf32>
    %92 = arith.addf %91, %90 : vector<8x96xf32>
    %93 = arith.divf %91, %92 : vector<8x96xf32>
    %94 = vector.extract_strided_slice %93 {offsets = [0, 0], sizes = [8, 32], strides = [1, 1]} : vector<8x96xf32> to vector<8x32xf32>
    %95 = vector.extract_strided_slice %93 {offsets = [0, 32], sizes = [8, 32], strides = [1, 1]} : vector<8x96xf32> to vector<8x32xf32>
    %96 = vector.extract_strided_slice %93 {offsets = [0, 64], sizes = [8, 32], strides = [1, 1]} : vector<8x96xf32> to vector<8x32xf32>
    %97 = vector.extract_strided_slice %87 {offsets = [0, 96], sizes = [8, 32], strides = [1, 1]} : vector<8x128xf32> to vector<8x32xf32>
    %98 = math.tanh %97 : vector<8x32xf32>
    %99 = arith.mulf %95, %82 : vector<8x32xf32>
    %100 = arith.mulf %94, %98 : vector<8x32xf32>
    %101 = arith.addf %99, %100 : vector<8x32xf32>
    %102 = math.tanh %101 : vector<8x32xf32>
    %103 = arith.mulf %96, %102 : vector<8x32xf32>
    %104 = vector.extract_strided_slice %6 {offsets = [40, 0], sizes = [8, 128], strides = [1, 1]} : vector<64x128xf32> to vector<8x128xf32>
    %cst_19 = arith.constant dense<0.000000e+00> : vector<8x128xf32>
    %105 = tpu.matmul %103, %1, %cst_19 {dimension_numbers = #tpu.dot_dimension_numbers<[1], [0], [0], [1], [0, 0, 1, 1], [], []>} : vector<8x32xf32>, vector<32x128xf32>, vector<8x128xf32> -> vector<8x128xf32>
    %106 = arith.addf %104, %105 : vector<8x128xf32>
    %107 = vector.extract_strided_slice %106 {offsets = [0, 0], sizes = [8, 96], strides = [1, 1]} : vector<8x128xf32> to vector<8x96xf32>
    %108 = arith.negf %107 : vector<8x96xf32>
    %109 = math.exp %108 : vector<8x96xf32>
    %cst_20 = arith.constant 1.000000e+00 : f32
    %110 = vector.broadcast %cst_20 : f32 to vector<8x96xf32>
    %111 = arith.addf %110, %109 : vector<8x96xf32>
    %112 = arith.divf %110, %111 : vector<8x96xf32>
    %113 = vector.extract_strided_slice %112 {offsets = [0, 0], sizes = [8, 32], strides = [1, 1]} : vector<8x96xf32> to vector<8x32xf32>
    %114 = vector.extract_strided_slice %112 {offsets = [0, 32], sizes = [8, 32], strides = [1, 1]} : vector<8x96xf32> to vector<8x32xf32>
    %115 = vector.extract_strided_slice %112 {offsets = [0, 64], sizes = [8, 32], strides = [1, 1]} : vector<8x96xf32> to vector<8x32xf32>
    %116 = vector.extract_strided_slice %106 {offsets = [0, 96], sizes = [8, 32], strides = [1, 1]} : vector<8x128xf32> to vector<8x32xf32>
    %117 = math.tanh %116 : vector<8x32xf32>
    %118 = arith.mulf %114, %101 : vector<8x32xf32>
    %119 = arith.mulf %113, %117 : vector<8x32xf32>
    %120 = arith.addf %118, %119 : vector<8x32xf32>
    %121 = math.tanh %120 : vector<8x32xf32>
    %122 = arith.mulf %115, %121 : vector<8x32xf32>
    %123 = vector.extract_strided_slice %6 {offsets = [48, 0], sizes = [8, 128], strides = [1, 1]} : vector<64x128xf32> to vector<8x128xf32>
    %cst_21 = arith.constant dense<0.000000e+00> : vector<8x128xf32>
    %124 = tpu.matmul %122, %1, %cst_21 {dimension_numbers = #tpu.dot_dimension_numbers<[1], [0], [0], [1], [0, 0, 1, 1], [], []>} : vector<8x32xf32>, vector<32x128xf32>, vector<8x128xf32> -> vector<8x128xf32>
    %125 = arith.addf %123, %124 : vector<8x128xf32>
    %126 = vector.extract_strided_slice %125 {offsets = [0, 0], sizes = [8, 96], strides = [1, 1]} : vector<8x128xf32> to vector<8x96xf32>
    %127 = arith.negf %126 : vector<8x96xf32>
    %128 = math.exp %127 : vector<8x96xf32>
    %cst_22 = arith.constant 1.000000e+00 : f32
    %129 = vector.broadcast %cst_22 : f32 to vector<8x96xf32>
    %130 = arith.addf %129, %128 : vector<8x96xf32>
    %131 = arith.divf %129, %130 : vector<8x96xf32>
    %132 = vector.extract_strided_slice %131 {offsets = [0, 0], sizes = [8, 32], strides = [1, 1]} : vector<8x96xf32> to vector<8x32xf32>
    %133 = vector.extract_strided_slice %131 {offsets = [0, 32], sizes = [8, 32], strides = [1, 1]} : vector<8x96xf32> to vector<8x32xf32>
    %134 = vector.extract_strided_slice %131 {offsets = [0, 64], sizes = [8, 32], strides = [1, 1]} : vector<8x96xf32> to vector<8x32xf32>
    %135 = vector.extract_strided_slice %125 {offsets = [0, 96], sizes = [8, 32], strides = [1, 1]} : vector<8x128xf32> to vector<8x32xf32>
    %136 = math.tanh %135 : vector<8x32xf32>
    %137 = arith.mulf %133, %120 : vector<8x32xf32>
    %138 = arith.mulf %132, %136 : vector<8x32xf32>
    %139 = arith.addf %137, %138 : vector<8x32xf32>
    %140 = math.tanh %139 : vector<8x32xf32>
    %141 = arith.mulf %134, %140 : vector<8x32xf32>
    %142 = vector.extract_strided_slice %6 {offsets = [56, 0], sizes = [8, 128], strides = [1, 1]} : vector<64x128xf32> to vector<8x128xf32>
    %cst_23 = arith.constant dense<0.000000e+00> : vector<8x128xf32>
    %143 = tpu.matmul %141, %1, %cst_23 {dimension_numbers = #tpu.dot_dimension_numbers<[1], [0], [0], [1], [0, 0, 1, 1], [], []>} : vector<8x32xf32>, vector<32x128xf32>, vector<8x128xf32> -> vector<8x128xf32>
    %144 = arith.addf %142, %143 : vector<8x128xf32>
    %145 = vector.extract_strided_slice %144 {offsets = [0, 0], sizes = [8, 96], strides = [1, 1]} : vector<8x128xf32> to vector<8x96xf32>
    %146 = arith.negf %145 : vector<8x96xf32>
    %147 = math.exp %146 : vector<8x96xf32>
    %cst_24 = arith.constant 1.000000e+00 : f32
    %148 = vector.broadcast %cst_24 : f32 to vector<8x96xf32>
    %149 = arith.addf %148, %147 : vector<8x96xf32>
    %150 = arith.divf %148, %149 : vector<8x96xf32>
    %151 = vector.extract_strided_slice %150 {offsets = [0, 0], sizes = [8, 32], strides = [1, 1]} : vector<8x96xf32> to vector<8x32xf32>
    %152 = vector.extract_strided_slice %150 {offsets = [0, 32], sizes = [8, 32], strides = [1, 1]} : vector<8x96xf32> to vector<8x32xf32>
    %153 = vector.extract_strided_slice %150 {offsets = [0, 64], sizes = [8, 32], strides = [1, 1]} : vector<8x96xf32> to vector<8x32xf32>
    %154 = vector.extract_strided_slice %144 {offsets = [0, 96], sizes = [8, 32], strides = [1, 1]} : vector<8x128xf32> to vector<8x32xf32>
    %155 = math.tanh %154 : vector<8x32xf32>
    %156 = arith.mulf %152, %139 : vector<8x32xf32>
    %157 = arith.mulf %151, %155 : vector<8x32xf32>
    %158 = arith.addf %156, %157 : vector<8x32xf32>
    %159 = math.tanh %158 : vector<8x32xf32>
    %160 = arith.mulf %153, %159 : vector<8x32xf32>
    %161 = tpu.concatenate %27, %46, %65, %84, %103, %122, %141, %160 in 1 : vector<8x32xf32>, vector<8x32xf32>, vector<8x32xf32>, vector<8x32xf32>, vector<8x32xf32>, vector<8x32xf32>, vector<8x32xf32>, vector<8x32xf32> -> vector<8x256xf32>
    %c0_25 = arith.constant 0 : index
    %c0_26 = arith.constant 0 : index
    %162 = vector.load %arg6[%c0_25, %c0_26] : memref<8x256xf32, #tpu.memory_space<vmem>>, vector<8x256xf32>
    tpu.vector_store %arg6[%c0_25, %c0_26], %161 {strides = array<i32>} : memref<8x256xf32, #tpu.memory_space<vmem>>, vector<8x256xf32>,
    %c0_27 = arith.constant 0 : index
    %c0_28 = arith.constant 0 : index
    %163 = vector.load %arg7[%c0_27, %c0_28] : memref<8x32xf32, #tpu.memory_space<vmem>>, vector<8x32xf32>
    tpu.vector_store %arg7[%c0_27, %c0_28], %158 {strides = array<i32>} : memref<8x32xf32, #tpu.memory_space<vmem>>, vector<8x32xf32>,
    %c0_29 = arith.constant 0 : index
    %c0_30 = arith.constant 0 : index
    %164 = vector.load %arg4[%c0_29, %c0_30] : memref<32x2xf32, #tpu.memory_space<vmem>>, vector<32x2xf32>
    %cst_31 = arith.constant dense<0.000000e+00> : vector<8x2xf32>
    %165 = tpu.matmul %160, %164, %cst_31 {dimension_numbers = #tpu.dot_dimension_numbers<[1], [0], [0], [1], [0, 0, 1, 1], [], []>} : vector<8x32xf32>, vector<32x2xf32>, vector<8x2xf32> -> vector<8x2xf32>
    %c0_32 = arith.constant 0 : index
    %c0_33 = arith.constant 0 : index
    %166 = vector.load %arg5[%c0_32, %c0_33] : memref<1x2xf32, #tpu.memory_space<vmem>>, vector<1x2xf32>
    %167 = vector.broadcast %166 : vector<1x2xf32> to vector<8x2xf32>
    %168 = arith.addf %165, %167 : vector<8x2xf32>
    %cst_34 = arith.constant dense<0xFF800000> : vector<8xf32>
    %169 = vector.multi_reduction <maximumf>, %168, %cst_34 [1] : vector<8x2xf32> to vector<8xf32>
    %170 = vector.shape_cast %169 : vector<8xf32> to vector<8x1xf32>
    %171 = vector.broadcast %170 : vector<8x1xf32> to vector<8x2xf32>
    %172 = arith.subf %168, %171 : vector<8x2xf32>
    %173 = math.exp %172 : vector<8x2xf32>
    %cst_35 = arith.constant dense<0.000000e+00> : vector<8xf32>
    %174 = vector.multi_reduction <add>, %173, %cst_35 [1] : vector<8x2xf32> to vector<8xf32>
    %175 = vector.shape_cast %174 : vector<8xf32> to vector<8x1xf32>
    %176 = vector.broadcast %175 : vector<8x1xf32> to vector<8x2xf32>
    %177 = arith.divf %173, %176 : vector<8x2xf32>
    %c0_36 = arith.constant 0 : index
    %c0_37 = arith.constant 0 : index
    %178 = vector.load %arg8[%c0_36, %c0_37] : memref<8x2xf32, #tpu.memory_space<vmem>>, vector<8x2xf32>
    tpu.vector_store %arg8[%c0_36, %c0_37], %177 {strides = array<i32>} : memref<8x2xf32, #tpu.memory_space<vmem>>, vector<8x2xf32>,
    return
  }
}

</mosaic_0001>

<bundles_post_ra>
// kernel: decoder_forward.1
= control target key start
LH: loop header
LB: loop body
LE: loop exit
PB: predicated region body
PF: predicated region fallthrough
CT: control target
= control target key end

     0   :  { %vm44_vm0 = vcmask 130048   ;;  %v815_v8 = vmov 0.0   ;;  %s816_s21 = smov 32   ;;  %s817_s25 = smov 64   ;;  %vm110_vm5 = vcmask 261120   ;;  %s1079_s1 = inlined_call_operand.vmem [shape: f32[16,128], index: 1, kind: input, shape index: {}]   ;;  %s1080_s0 = inlined_call_operand.vmem [shape: f32[64,16], index: 0, kind: input, shape index: {}]   ;;  %s1081_s2 = inlined_call_operand.vmem [shape: f32[32,128], index: 2, kind: input, shape index: {}]   ;;  %s1082_s3 = inlined_call_operand.vmem [shape: f32[1,128], index: 3, kind: input, shape index: {}]   ;;  %s1083_s4 = inlined_call_operand.vmem [shape: f32[32,2], index: 4, kind: input, shape index: {}]   ;;  %s1084_s5 = inlined_call_operand.vmem [shape: f32[1,2], index: 5, kind: input, shape index: {}]   ;;  %s1085_s6 = inlined_call_operand.vmem [shape: f32[8,256], index: 6, kind: output, shape index: {0}]   ;;  %s1086_s7 = inlined_call_operand.vmem [shape: f32[8,32], index: 7, kind: output, shape index: {1}]   ;;  %s1087_s8 = inlined_call_operand.vmem [shape: f32[8,2], index: 8, kind: output, shape index: {2}]  }
   0x1   :  { %v27_v0 = vld [vmem:[%s1079_s1 + $0x8] sm:$0xff]  ;;  %v26_v1 = vld [vmem:[%s1079_s1] sm:$0xff]  ;;  %v876_v3 = vld [vmem:[%s1081_s2 + $0x18] sm:$0xff] }
   0x2   :  { %737 = vmatpush.msra.mxu1 %v27_v0  ;;  %v38_v2 = vld [vmem:[%s1080_s0 + $0x28] sm:$0xff]  ;;  %83 = vmatpush.msra.mxu0 %v27_v0  ;;  %v33_v4 = vld [vmem:[%s1080_s0] sm:$0xff]  ;;  %v886_v5 = vld [vmem:[%s1081_s2 + $0x10] sm:$0xff] }
   0x3   :  { %738 = vmatpush.msra.mxu2 %v27_v0  ;;  %252 = vmatpush.msra.mxu3 %v876_v3  ;;  %v893_v6 = vld [vmem:[%s1081_s2 + $0x8] sm:$0xff]  ;;  %v901_v7 = vld [vmem:[%s1081_s2] sm:$0xff]  ;;  %v39_v35 = vld [vmem:[%s1080_s0 + $0x30] sm:$0xff] }
   0x4   :  { %739 = vmatpush.msra.mxu1 %v26_v1  ;;  %84 = vmatpush.msra.mxu0 %v26_v1  ;;  %v927_v11 = vld [vmem:[%s1082_s3] ss:$0 sm:$0xff]  ;;  %v40_v36 = vld [vmem:[%s1080_s0 + $0x38] sm:$0xff]  ;;  %v34_v39 = vld [vmem:[%s1080_s0 + $0x8] sm:$0xff] }
   0x5   :  { %718 = vmatmul.msk.f32.vlgmr.msra.gmra.mxu1 %vm44_vm0, %v38_v2  ;;  %713 = vmatmul.msk.f32.vlgmr.msra.gmra.mxu0 %vm44_vm0, %v33_v4 }
   0x6   :  { %126 = vmatpush.msrb.mxu1 %v876_v3  ;;  %740 = vmatpush.msra.mxu2 %v26_v1 }
   0x7   :  { %253 = vmatpush.msra.mxu3 %v886_v5  ;;  %719 = vmatmul.msk.f32.vlgmr.msra.gmra.mxu2 %vm44_vm0, %v39_v35 }
   0x8   :  { %189 = vmatpush.msrb.mxu2 %v876_v3  ;;  %127 = vmatpush.msrb.mxu1 %v886_v5 }
   0x9   :  { %254 = vmatpush.msra.mxu3 %v893_v6 }
   0xa   :  { %190 = vmatpush.msrb.mxu2 %v886_v5  ;;  %128 = vmatpush.msrb.mxu1 %v893_v6 }
   0xb   :  { %255 = vmatpush.msra.mxu3 %v901_v7 }
   0xc   :  { %191 = vmatpush.msrb.mxu2 %v893_v6  ;;  %129 = vmatpush.msrb.mxu1 %v901_v7 }
   0xd   :  { %441 = vmatpush.msrb.mxu3 %v876_v3  ;;  %130 = vmatmul.f32.vlgmr.msrb.gmra.mxu1 %v815_v8 }
   0xe   :  { %192 = vmatpush.msrb.mxu2 %v901_v7  ;;  %315 = vmatpush.msra.mxu1 %v876_v3 }
   0xf   :  { %442 = vmatpush.msrb.mxu3 %v886_v5  ;;  %720 = vmatmul.msk.f32.gmra.mxu2 %vm44_vm0, %v40_v36 }
  0x10   :  { %316 = vmatpush.msra.mxu1 %v886_v5  ;;  %378 = vmatpush.msra.mxu2 %v876_v3 }
  0x11   :  { %443 = vmatpush.msrb.mxu3 %v893_v6  ;;  %714 = vmatmul.msk.f32.gmra.mxu0 %vm44_vm0, %v34_v39 }
  0x12   :  { %317 = vmatpush.msra.mxu1 %v893_v6  ;;  %379 = vmatpush.msra.mxu2 %v886_v5 }
  0x13   :  { %444 = vmatpush.msrb.mxu3 %v901_v7 }
  0x14   :  { %318 = vmatpush.msra.mxu1 %v901_v7  ;;  %380 = vmatpush.msra.mxu2 %v893_v6 }
  0x16   :  { %504 = vmatpush.msrb.mxu1 %v876_v3  ;;  %381 = vmatpush.msra.mxu2 %v901_v7 }
  0x18   :  { %505 = vmatpush.msrb.mxu1 %v886_v5 }
  0x1a   :  { %506 = vmatpush.msrb.mxu1 %v893_v6 }
  0x1c   :  { %507 = vmatpush.msrb.mxu1 %v901_v7 }
  0x82   :  { %v922_v9 = vpop.f32.mrf.mxu1  ;;  %v86_v10 = vpop.f32.mrf.mxu0 }
  0x83   :  { %v87_v12 = vadd.f32 %v927_v11, %v86_v10 }
  0x8a   :  { %v131_v13 = vpop.f32.mrf.mxu1  ;;  %v958_v41 = vpop.f32.mrf.mxu2 }
  0x8b   :  { %v134_v14 = vadd.f32 %v131_v13, %v87_v12 }
  0x8d   :  { %747 = vtanh.f32 %v134_v14  ;;  %v721_v16 = vmul.f32 -1.442695, %v134_v14 }
  0x8e   :  { %v89_v43 = vpop.f32.mrf.mxu0 }
  0x8f   :  { %749 = vpow2.f32 %v721_v16  ;;  %v90_v44 = vadd.f32 %v927_v11, %v89_v43 }
  0x92   :  { %v960_v42 = vpop.f32.mrf.mxu2 }
  0x93   :  { %v748_v15 = vpop.eup %747 }
  0x94   :  { %157 = vrot.lane.b32.xlu0 %v748_v15, %s816_s21 }
  0x95   :  { %v750_v17 = vpop.eup %749 }
  0x96   :  { %v138_v18 = vadd.f32 1.0, %v750_v17 }
  0x98   :  { %751 = vrcp.f32 %v138_v18  ;;  %v150_v24 = vand.u32 2147483648, %v138_v18  ;;  %vm144_vm2 = vweird.f32 %v138_v18  ;;  %v148_v25 = vand.u32 2147483647, %v138_v18 }
  0x9a   :  { %v151_v27 = vor.u32 1.1754944e-38, %v150_v24  ;;  %vm149_vm4 = vcmp.eq.f32.partialorder %v148_v25, 8.507059e+37 }
  0x9e   :  { %v752_v19 = vpop.eup %751 }
  0x9f   :  { %v140_v20 = vmul.f32 %v752_v19, %v138_v18  ;;  %vm145_vm1 = vweird.f32 %v752_v19 }
  0xa0   :  { %vm146_vm3 = vmor %vm144_vm2, %vm145_vm1 }
  0xa1   :  { %v141_v21 = vsub.f32 1.0, %v140_v20 }
  0xa3   :  { %v142_v22 = vmul.f32 %v752_v19, %v141_v21 }
  0xa5   :  { %v143_v23 = vadd.f32 %v752_v19, %v142_v22 }
  0xa7   :  { %v147_v26 = vsel %vm146_vm3, %v752_v19, %v143_v23 }
  0xa8   :  { %v152_v29 = vsel %vm149_vm4, %v151_v27, %v147_v26 }
  0xa9   :  { %v155_v31 = vmul.f32 0.0, %v152_v29 }
 0x106   :  { %v158_v28 = vpop.permute.xlu0 %157 }
 0x107   :  { %v160_v30 = vmul.f32 %v158_v28, %v152_v29 }
 0x109   :  { %162 = vrot.lane.b32.xlu0 %v160_v30, %s816_s21 }
 0x17b   :  { %v163_v32 = vpop.permute.xlu0 %162 }
 0x17c   :  { %v165_v33 = vadd.f32 %v163_v32, %v155_v31 }
 0x17e   :  { %753 = vtanh.f32 %v165_v33 }
 0x184   :  { %v754_v34 = vpop.eup %753 }
 0x185   :  { %168 = vrot.lane.b32.xlu1 %v754_v34, %s816_s21 }
 0x1f7   :  { %v169_v37 = vpop.permute.xlu1 %168 }
 0x1f8   :  { %v171_v38 = vmul.f32 %v169_v37, %v152_v29 }
 0x1fa   :  { %173 = vrot.lane.b32.xlu1 %v171_v38, %s817_s25 }
 0x26c   :  { %v950_v40 = vpop.permute.xlu1 %173 }
 0x26d   :  { %722 = vmatmul.msk.f32.vlgmr.msrb.gmra.mxu2 %vm110_vm5, %v950_v40 }
 0x26e   :  { %567 = vmatpush.msrb.mxu2 %v876_v3 }
 0x270   :  { %568 = vmatpush.msrb.mxu2 %v886_v5  ;;  %v35_v5 = vld [vmem:[%s1080_s0 + $0x10] sm:$0xff] }
 0x271   :  { %715 = vmatmul.msk.f32.gmra.mxu0 %vm44_vm0, %v35_v5 }
 0x272   :  { %569 = vmatpush.msrb.mxu2 %v893_v6 }
 0x274   :  { %570 = vmatpush.msrb.mxu2 %v901_v7 }
 0x2ee   :  { %v92_v7 = vpop.f32.mrf.mxu0 }
 0x2ef   :  { %v93_v8 = vadd.f32 %v927_v11, %v92_v7 }
 0x2f0   :  { %v194_v45 = vpop.f32.mrf.mxu2 }
 0x2f1   :  { %v197_v46 = vadd.f32 %v194_v45, %v90_v44 }
 0x2f3   :  { %755 = vtanh.f32 %v197_v46  ;;  %v723_v48 = vmul.f32 -1.442695, %v197_v46 }
 0x2f5   :  { %757 = vpow2.f32 %v723_v48 }
 0x2f9   :  { %v756_v47 = vpop.eup %755 }
 0x2fa   :  { %220 = vrot.lane.b32.xlu2 %v756_v47, %s816_s21 }
 0x2fb   :  { %v758_v49 = vpop.eup %757 }
 0x2fc   :  { %v201_v50 = vadd.f32 1.0, %v758_v49 }
 0x2fe   :  { %759 = vrcp.f32 %v201_v50  ;;  %v213_v56 = vand.u32 2147483648, %v201_v50  ;;  %vm207_vm7 = vweird.f32 %v201_v50  ;;  %v211_v57 = vand.u32 2147483647, %v201_v50 }
 0x300   :  { %v214_v59 = vor.u32 1.1754944e-38, %v213_v56  ;;  %vm212_vm9 = vcmp.eq.f32.partialorder %v211_v57, 8.507059e+37 }
 0x304   :  { %v760_v51 = vpop.eup %759 }
 0x305   :  { %v203_v52 = vmul.f32 %v760_v51, %v201_v50  ;;  %vm208_vm6 = vweird.f32 %v760_v51 }
 0x306   :  { %vm209_vm8 = vmor %vm207_vm7, %vm208_vm6 }
 0x307   :  { %v204_v53 = vsub.f32 1.0, %v203_v52 }
 0x309   :  { %v205_v54 = vmul.f32 %v760_v51, %v204_v53 }
 0x30b   :  { %v206_v55 = vadd.f32 %v760_v51, %v205_v54 }
 0x30d   :  { %v210_v58 = vsel %vm209_vm8, %v760_v51, %v206_v55 }
 0x30e   :  { %v215_v61 = vsel %vm212_vm9, %v214_v59, %v210_v58 }
 0x30f   :  { %v218_v63 = vmul.f32 %v215_v61, %v165_v33  ;;  %v36_v33 = vld [vmem:[%s1080_s0 + $0x18] sm:$0xff] }
 0x310   :  { %716 = vmatmul.msk.f32.gmra.mxu0 %vm44_vm0, %v36_v33 }
 0x354   :  { %v221_v60 = vpop.permute.xlu2 %220 }
 0x355   :  { %v223_v62 = vmul.f32 %v221_v60, %v215_v61 }
 0x357   :  { %225 = vrot.lane.b32.xlu2 %v223_v62, %s816_s21 }
 0x38d   :  { %v95_v37 = vpop.f32.mrf.mxu0 }
 0x38e   :  { %v96_v38 = vadd.f32 %v927_v11, %v95_v37 }
 0x3b1   :  { %v226_v0 = vpop.permute.xlu2 %225 }
 0x3b2   :  { %v228_v1 = vadd.f32 %v226_v0, %v218_v63 }
 0x3b4   :  { %761 = vtanh.f32 %v228_v1 }
 0x3ba   :  { %v762_v2 = vpop.eup %761 }
 0x3bb   :  { %231 = vrot.lane.b32.xlu0 %v762_v2, %s816_s21  ;;  %v37_v2 = vld [vmem:[%s1080_s0 + $0x20] sm:$0xff]  ;;  %s818_s0 = smov 96  }
 0x3bc   :  { %717 = vmatmul.msk.f32.gmra.mxu0 %vm44_vm0, %v37_v2 }
 0x42d   :  { %v232_v3 = vpop.permute.xlu0 %231 }
 0x42e   :  { %v966_v4 = vmul.f32 %v232_v3, %v215_v61 }
 0x430   :  { %236 = vrot.lane.b32.xlu1 %v966_v4, %s817_s25 }
 0x439   :  { %v98_v5 = vpop.f32.mrf.mxu0 }
 0x4a2   :  { %v237_v6 = vpop.permute.xlu1 %236 }
 0x4a3   :  { %724 = vmatmul.msk.f32.vlgmr.msra.gmra.mxu3 %vm110_vm5, %v237_v6  ;;  %v99_v6 = vadd.f32 %v927_v11, %v98_v5 }
 0x526   :  { %v257_v10 = vpop.f32.mrf.mxu3 }
 0x527   :  { %v260_v12 = vadd.f32 %v257_v10, %v93_v8 }
 0x529   :  { %763 = vtanh.f32 %v260_v12  ;;  %v725_v14 = vmul.f32 -1.442695, %v260_v12 }
 0x52b   :  { %765 = vpow2.f32 %v725_v14 }
 0x52f   :  { %v764_v13 = vpop.eup %763 }
 0x530   :  { %283 = vrot.lane.b32.xlu2 %v764_v13, %s816_s21 }
 0x531   :  { %v766_v15 = vpop.eup %765 }
 0x532   :  { %v264_v16 = vadd.f32 1.0, %v766_v15 }
 0x534   :  { %767 = vrcp.f32 %v264_v16  ;;  %v276_v22 = vand.u32 2147483648, %v264_v16  ;;  %vm270_vm11 = vweird.f32 %v264_v16  ;;  %v274_v23 = vand.u32 2147483647, %v264_v16 }
 0x536   :  { %v277_v25 = vor.u32 1.1754944e-38, %v276_v22  ;;  %vm275_vm13 = vcmp.eq.f32.partialorder %v274_v23, 8.507059e+37 }
 0x53a   :  { %v768_v17 = vpop.eup %767 }
 0x53b   :  { %v266_v18 = vmul.f32 %v768_v17, %v264_v16  ;;  %vm271_vm10 = vweird.f32 %v768_v17 }
 0x53c   :  { %vm272_vm12 = vmor %vm270_vm11, %vm271_vm10 }
 0x53d   :  { %v267_v19 = vsub.f32 1.0, %v266_v18 }
 0x53f   :  { %v268_v20 = vmul.f32 %v768_v17, %v267_v19 }
 0x541   :  { %v269_v21 = vadd.f32 %v768_v17, %v268_v20 }
 0x543   :  { %v273_v24 = vsel %vm272_vm12, %v768_v17, %v269_v21 }
 0x544   :  { %v278_v27 = vsel %vm275_vm13, %v277_v25, %v273_v24 }
 0x545   :  { %v281_v29 = vmul.f32 %v278_v27, %v228_v1 }
 0x58a   :  { %v284_v26 = vpop.permute.xlu2 %283 }
 0x58b   :  { %v286_v28 = vmul.f32 %v284_v26, %v278_v27 }
 0x58d   :  { %288 = vrot.lane.b32.xlu0 %v286_v28, %s816_s21 }
 0x5ff   :  { %v289_v30 = vpop.permute.xlu0 %288 }
 0x600   :  { %v291_v31 = vadd.f32 %v289_v30, %v281_v29 }
 0x602   :  { %769 = vtanh.f32 %v291_v31 }
 0x608   :  { %v770_v32 = vpop.eup %769 }
 0x609   :  { %294 = vrot.lane.b32.xlu1 %v770_v32, %s816_s21 }
 0x67b   :  { %v295_v34 = vpop.permute.xlu1 %294 }
 0x67c   :  { %v983_v35 = vmul.f32 %v295_v34, %v278_v27  ;;  %v102_v34 = vadd.f32 %v927_v11, %v922_v9 }
 0x67e   :  { %299 = vrot.lane.b32.xlu2 %v983_v35, %s817_s25 }
 0x6d8   :  { %v300_v36 = vpop.permute.xlu2 %299 }
 0x6d9   :  { %726 = vmatmul.msk.f32.vlgmr.msra.gmra.mxu1 %vm110_vm5, %v300_v36 }
 0x756   :  { %v320_v39 = vpop.f32.mrf.mxu1 }
 0x757   :  { %v323_v43 = vadd.f32 %v320_v39, %v96_v38 }
 0x759   :  { %771 = vtanh.f32 %v323_v43  ;;  %v727_v45 = vmul.f32 -1.442695, %v323_v43 }
 0x75b   :  { %773 = vpow2.f32 %v727_v45 }
 0x75f   :  { %v772_v44 = vpop.eup %771 }
 0x760   :  { %346 = vrot.lane.b32.xlu0 %v772_v44, %s816_s21 }
 0x761   :  { %v774_v46 = vpop.eup %773 }
 0x762   :  { %v327_v47 = vadd.f32 1.0, %v774_v46 }
 0x764   :  { %775 = vrcp.f32 %v327_v47  ;;  %v339_v53 = vand.u32 2147483648, %v327_v47  ;;  %vm333_vm15 = vweird.f32 %v327_v47  ;;  %v337_v54 = vand.u32 2147483647, %v327_v47 }
 0x766   :  { %v340_v56 = vor.u32 1.1754944e-38, %v339_v53  ;;  %vm338_vm2 = vcmp.eq.f32.partialorder %v337_v54, 8.507059e+37 }
 0x76a   :  { %v776_v48 = vpop.eup %775 }
 0x76b   :  { %v329_v49 = vmul.f32 %v776_v48, %v327_v47  ;;  %vm334_vm14 = vweird.f32 %v776_v48 }
 0x76c   :  { %vm335_vm1 = vmor %vm333_vm15, %vm334_vm14 }
 0x76d   :  { %v330_v50 = vsub.f32 1.0, %v329_v49 }
 0x76f   :  { %v331_v51 = vmul.f32 %v776_v48, %v330_v50 }
 0x771   :  { %v332_v52 = vadd.f32 %v776_v48, %v331_v51 }
 0x773   :  { %v336_v55 = vsel %vm335_vm1, %v776_v48, %v332_v52 }
 0x774   :  { %v341_v58 = vsel %vm338_vm2, %v340_v56, %v336_v55 }
 0x775   :  { %v344_v60 = vmul.f32 %v341_v58, %v291_v31 }
 0x7d2   :  { %v347_v57 = vpop.permute.xlu0 %346 }
 0x7d3   :  { %v349_v59 = vmul.f32 %v347_v57, %v341_v58 }
 0x7d5   :  { %351 = vrot.lane.b32.xlu1 %v349_v59, %s816_s21 }
 0x847   :  { %v352_v61 = vpop.permute.xlu1 %351 }
 0x848   :  { %v354_v62 = vadd.f32 %v352_v61, %v344_v60 }
 0x84a   :  { %777 = vtanh.f32 %v354_v62 }
 0x850   :  { %v778_v63 = vpop.eup %777 }
 0x851   :  { %357 = vrot.lane.b32.xlu2 %v778_v63, %s816_s21  ;;  %v105_v63 = vadd.f32 %v927_v11, %v958_v41 }
 0x8ab   :  { %v358_v0 = vpop.permute.xlu2 %357 }
 0x8ac   :  { %v992_v1 = vmul.f32 %v358_v0, %v341_v58 }
 0x8ae   :  { %362 = vrot.lane.b32.xlu0 %v992_v1, %s817_s25 }
 0x920   :  { %v363_v3 = vpop.permute.xlu0 %362 }
 0x921   :  { %728 = vmatmul.msk.f32.vlgmr.msra.gmra.mxu2 %vm110_vm5, %v363_v3 }
 0x9a4   :  { %v383_v7 = vpop.f32.mrf.mxu2 }
 0x9a5   :  { %v386_v8 = vadd.f32 %v383_v7, %v99_v6 }
 0x9a7   :  { %779 = vtanh.f32 %v386_v8  ;;  %v729_v12 = vmul.f32 -1.442695, %v386_v8 }
 0x9a9   :  { %781 = vpow2.f32 %v729_v12 }
 0x9ad   :  { %v780_v10 = vpop.eup %779 }
 0x9ae   :  { %409 = vrot.lane.b32.xlu1 %v780_v10, %s816_s21 }
 0x9af   :  { %v782_v13 = vpop.eup %781 }
 0x9b0   :  { %v390_v14 = vadd.f32 1.0, %v782_v13 }
 0x9b2   :  { %783 = vrcp.f32 %v390_v14  ;;  %v402_v20 = vand.u32 2147483648, %v390_v14  ;;  %vm396_vm3 = vweird.f32 %v390_v14  ;;  %v400_v21 = vand.u32 2147483647, %v390_v14 }
 0x9b4   :  { %v403_v23 = vor.u32 1.1754944e-38, %v402_v20  ;;  %vm401_vm6 = vcmp.eq.f32.partialorder %v400_v21, 8.507059e+37 }
 0x9b8   :  { %v784_v15 = vpop.eup %783 }
 0x9b9   :  { %v392_v16 = vmul.f32 %v784_v15, %v390_v14  ;;  %vm397_vm0 = vweird.f32 %v784_v15 }
 0x9ba   :  { %vm398_vm4 = vmor %vm396_vm3, %vm397_vm0  ;;  %vm629_vm3 = vcmask 523264  }
 0x9bb   :  { %v393_v17 = vsub.f32 1.0, %v392_v16 }
 0x9bd   :  { %v394_v18 = vmul.f32 %v784_v15, %v393_v17 }
 0x9bf   :  { %v395_v19 = vadd.f32 %v784_v15, %v394_v18 }
 0x9c1   :  { %v399_v22 = vsel %vm398_vm4, %v784_v15, %v395_v19  ;;  %vm631_vm4 = vcmask 785408  }
 0x9c2   :  { %v404_v25 = vsel %vm401_vm6, %v403_v23, %v399_v22  ;;  %vm675_vm6 = vcmask 15360  }
 0x9c3   :  { %v407_v27 = vmul.f32 %v404_v25, %v354_v62 }
 0xa20   :  { %v410_v24 = vpop.permute.xlu1 %409 }
 0xa21   :  { %v412_v26 = vmul.f32 %v410_v24, %v404_v25 }
 0xa23   :  { %414 = vrot.lane.b32.xlu2 %v412_v26, %s816_s21 }
 0xa7d   :  { %v415_v28 = vpop.permute.xlu2 %414 }
 0xa7e   :  { %v417_v29 = vadd.f32 %v415_v28, %v407_v27  ;;  %v108_v28 = vadd.f32 %v927_v11, %v960_v42 }
 0xa80   :  { %785 = vtanh.f32 %v417_v29 }
 0xa86   :  { %v786_v30 = vpop.eup %785 }
 0xa87   :  { %420 = vrot.lane.b32.xlu0 %v786_v30, %s816_s21 }
 0xaf9   :  { %v421_v31 = vpop.permute.xlu0 %420 }
 0xafa   :  { %v423_v32 = vmul.f32 %v421_v31, %v404_v25 }
 0xafc   :  { %425 = vrot.lane.b32.xlu1 %v423_v32, %s817_s25 }
 0xb6e   :  { %v1006_v33 = vpop.permute.xlu1 %425 }
 0xb6f   :  { %730 = vmatmul.msk.f32.vlgmr.msrb.gmra.mxu3 %vm110_vm5, %v1006_v33 }
 0xbf2   :  { %v446_v36 = vpop.f32.mrf.mxu3 }
 0xbf3   :  { %v449_v37 = vadd.f32 %v446_v36, %v102_v34 }
 0xbf5   :  { %787 = vtanh.f32 %v449_v37  ;;  %v731_v39 = vmul.f32 -1.442695, %v449_v37 }
 0xbf7   :  { %789 = vpow2.f32 %v731_v39 }
 0xbfb   :  { %v788_v38 = vpop.eup %787 }
 0xbfc   :  { %472 = vrot.lane.b32.xlu2 %v788_v38, %s816_s21 }
 0xbfd   :  { %v790_v43 = vpop.eup %789 }
 0xbfe   :  { %v453_v44 = vadd.f32 1.0, %v790_v43 }
 0xc00   :  { %791 = vrcp.f32 %v453_v44  ;;  %v465_v50 = vand.u32 2147483648, %v453_v44  ;;  %vm459_vm8 = vweird.f32 %v453_v44  ;;  %v463_v9 = vand.u32 2147483647, %v453_v44 }
 0xc02   :  { %v466_v52 = vor.u32 1.1754944e-38, %v465_v50  ;;  %vm464_vm10 = vcmp.eq.f32.partialorder %v463_v9, 8.507059e+37 }
 0xc06   :  { %v792_v45 = vpop.eup %791 }
 0xc07   :  { %v455_v46 = vmul.f32 %v792_v45, %v453_v44  ;;  %vm460_vm7 = vweird.f32 %v792_v45 }
 0xc08   :  { %vm461_vm9 = vmor %vm459_vm8, %vm460_vm7 }
 0xc09   :  { %v456_v47 = vsub.f32 1.0, %v455_v46 }
 0xc0b   :  { %v457_v48 = vmul.f32 %v792_v45, %v456_v47 }
 0xc0d   :  { %v458_v49 = vadd.f32 %v792_v45, %v457_v48 }
 0xc0f   :  { %v462_v51 = vsel %vm461_vm9, %v792_v45, %v458_v49 }
 0xc10   :  { %v467_v54 = vsel %vm464_vm10, %v466_v52, %v462_v51 }
 0xc11   :  { %v470_v56 = vmul.f32 %v467_v54, %v417_v29 }
 0xc56   :  { %v473_v53 = vpop.permute.xlu2 %472 }
 0xc57   :  { %v475_v55 = vmul.f32 %v473_v53, %v467_v54 }
 0xc59   :  { %477 = vrot.lane.b32.xlu0 %v475_v55, %s816_s21  ;;  %v646_v55 = vld [vmem:[%s1083_s4 + $0x18] sm:$0xff] }
 0xc5a   :  { %667 = vmatpush.msra.mxu3 %v646_v55 }
 0xccb   :  { %v478_v57 = vpop.permute.xlu0 %477 }
 0xccc   :  { %v480_v58 = vadd.f32 %v478_v57, %v470_v56  ;;  %v645_v56 = vld [vmem:[%s1083_s4 + $0x10] sm:$0xff]  ;;  %v644_v57 = vld [vmem:[%s1083_s4 + $0x8] sm:$0xff] }
 0xccd   :  { %668 = vmatpush.msra.mxu3 %v645_v56 }
 0xcce   :  { %793 = vtanh.f32 %v480_v58 }
 0xccf   :  { %669 = vmatpush.msra.mxu3 %v644_v57 }
 0xcd4   :  { %v794_v59 = vpop.eup %793 }
 0xcd5   :  { %483 = vrot.lane.b32.xlu1 %v794_v59, %s816_s21 }
 0xd47   :  { %v484_v60 = vpop.permute.xlu1 %483 }
 0xd48   :  { %v1015_v61 = vmul.f32 %v484_v60, %v467_v54 }
 0xd4a   :  { %488 = vrot.lane.b32.xlu2 %v1015_v61, %s817_s25 }
 0xda4   :  { %v489_v62 = vpop.permute.xlu2 %488 }
 0xda5   :  { %732 = vmatmul.msk.f32.vlgmr.msrb.gmra.mxu1 %vm110_vm5, %v489_v62 }
 0xe22   :  { %v509_v0 = vpop.f32.mrf.mxu1 }
 0xe23   :  { %v512_v2 = vadd.f32 %v509_v0, %v105_v63 }
 0xe25   :  { %795 = vtanh.f32 %v512_v2  ;;  %v733_v5 = vmul.f32 -1.442695, %v512_v2 }
 0xe27   :  { %797 = vpow2.f32 %v733_v5 }
 0xe2b   :  { %v796_v3 = vpop.eup %795 }
 0xe2c   :  { %535 = vrot.lane.b32.xlu0 %v796_v3, %s816_s21 }
 0xe2d   :  { %v798_v6 = vpop.eup %797 }
 0xe2e   :  { %v516_v7 = vadd.f32 1.0, %v798_v6 }
 0xe30   :  { %799 = vrcp.f32 %v516_v7  ;;  %v528_v15 = vand.u32 2147483648, %v516_v7  ;;  %vm522_vm12 = vweird.f32 %v516_v7  ;;  %v526_v41 = vand.u32 2147483647, %v516_v7 }
 0xe32   :  { %v529_v17 = vor.u32 1.1754944e-38, %v528_v15  ;;  %vm527_vm14 = vcmp.eq.f32.partialorder %v526_v41, 8.507059e+37 }
 0xe36   :  { %v800_v8 = vpop.eup %799 }
 0xe37   :  { %v518_v10 = vmul.f32 %v800_v8, %v516_v7  ;;  %vm523_vm11 = vweird.f32 %v800_v8 }
 0xe38   :  { %vm524_vm13 = vmor %vm522_vm12, %vm523_vm11 }
 0xe39   :  { %v519_v12 = vsub.f32 1.0, %v518_v10 }
 0xe3b   :  { %v520_v13 = vmul.f32 %v800_v8, %v519_v12 }
 0xe3d   :  { %v521_v14 = vadd.f32 %v800_v8, %v520_v13 }
 0xe3f   :  { %v525_v16 = vsel %vm524_vm13, %v800_v8, %v521_v14 }
 0xe40   :  { %v530_v19 = vsel %vm527_vm14, %v529_v17, %v525_v16 }
 0xe41   :  { %v533_v21 = vmul.f32 %v530_v19, %v480_v58  ;;  %v643_v58 = vld [vmem:[%s1083_s4] sm:$0xff] }
 0xe42   :  { %670 = vmatpush.msra.mxu3 %v643_v58 }
 0xe9e   :  { %v536_v18 = vpop.permute.xlu0 %535 }
 0xe9f   :  { %v538_v20 = vmul.f32 %v536_v18, %v530_v19 }
 0xea1   :  { %540 = vrot.lane.b32.xlu1 %v538_v20, %s816_s21 }
 0xf13   :  { %v541_v22 = vpop.permute.xlu1 %540 }
 0xf14   :  { %v543_v23 = vadd.f32 %v541_v22, %v533_v21 }
 0xf16   :  { %801 = vtanh.f32 %v543_v23 }
 0xf1c   :  { %v802_v24 = vpop.eup %801 }
 0xf1d   :  { %546 = vrot.lane.b32.xlu2 %v802_v24, %s816_s21 }
 0xf77   :  { %v547_v25 = vpop.permute.xlu2 %546 }
 0xf78   :  { %v1025_v26 = vmul.f32 %v547_v25, %v530_v19 }
 0xf7a   :  { %551 = vrot.lane.b32.xlu0 %v1025_v26, %s817_s25 }
 0xfec   :  { %v552_v27 = vpop.permute.xlu0 %551 }
 0xfed   :  { %734 = vmatmul.msk.f32.vlgmr.msrb.gmra.mxu2 %vm110_vm5, %v552_v27 }
0x1070   :  { %v572_v29 = vpop.f32.mrf.mxu2 }
0x1071   :  { %v575_v30 = vadd.f32 %v572_v29, %v108_v28 }
0x1073   :  { %803 = vtanh.f32 %v575_v30  ;;  %v735_v32 = vmul.f32 -1.442695, %v575_v30 }
0x1075   :  { %805 = vpow2.f32 %v735_v32 }
0x1079   :  { %v804_v31 = vpop.eup %803 }
0x107a   :  { %598 = vrot.lane.b32.xlu1 %v804_v31, %s816_s21 }
0x107b   :  { %v806_v34 = vpop.eup %805 }
0x107c   :  { %v579_v36 = vadd.f32 1.0, %v806_v34 }
0x107e   :  { %807 = vrcp.f32 %v579_v36  ;;  %v591_v45 = vand.u32 2147483648, %v579_v36  ;;  %vm585_vm1 = vweird.f32 %v579_v36  ;;  %v589_v11 = vand.u32 2147483647, %v579_v36 }
0x1080   :  { %v592_v46 = vor.u32 1.1754944e-38, %v591_v45  ;;  %vm590_vm0 = vcmp.eq.f32.partialorder %v589_v11, 8.507059e+37 }
0x1084   :  { %v808_v37 = vpop.eup %807 }
0x1085   :  { %v581_v38 = vmul.f32 %v808_v37, %v579_v36  ;;  %vm586_vm15 = vweird.f32 %v808_v37 }
0x1086   :  { %vm587_vm2 = vmor %vm585_vm1, %vm586_vm15 }
0x1087   :  { %v582_v39 = vsub.f32 1.0, %v581_v38 }
0x1089   :  { %v583_v43 = vmul.f32 %v808_v37, %v582_v39 }
0x108b   :  { %v584_v44 = vadd.f32 %v808_v37, %v583_v43 }
0x108d   :  { %v588_v42 = vsel %vm587_vm2, %v808_v37, %v584_v44 }
0x108e   :  { %v593_v48 = vsel %vm590_vm0, %v592_v46, %v588_v42 }
0x108f   :  { %v596_v50 = vmul.f32 %v593_v48, %v543_v23 }
0x10ec   :  { %v599_v47 = vpop.permute.xlu1 %598 }
0x10ed   :  { %v601_v49 = vmul.f32 %v599_v47, %v593_v48 }
0x10ef   :  { %603 = vrot.lane.b32.xlu2 %v601_v49, %s816_s21 }
0x1149   :  { %v604_v9 = vpop.permute.xlu2 %603 }
0x114a   :  { %v606_v51 = vadd.f32 %v604_v9, %v596_v50 }
0x114c   :  { %809 = vtanh.f32 %v606_v51 }
0x1152   :  { %v810_v52 = vpop.eup %809 }
0x1153   :  { %609 = vrot.lane.b32.xlu0 %v810_v52, %s816_s21 }
0x11c5   :  { %v610_v53 = vpop.permute.xlu0 %609 }
0x11c6   :  { %v612_v54 = vmul.f32 %v610_v53, %v593_v48 }
0x11c8   :  { %651 = vrot.lane.b32.xlu1 %v612_v54, %s817_s25 }
0x11d0   :  { %614 = vrot.lane.b32.xlu1 %v966_v4, %s818_s0 }
0x11d8   :  { %621 = vrot.lane.b32.xlu1 %v1015_v61, %s818_s0 }
0x11e0   :  { %617 = vrot.lane.b32.xlu1 %v992_v1, %s816_s21 }
0x11e8   :  { %625 = vrot.lane.b32.xlu1 %v612_v54, %s816_s21 }
0x11f0   :  { %639 = vrot.lane.b32.xlu1 %v606_v51, %s818_s0 }
0x123a   :  { %v652_v4 = vpop.permute.xlu1 %651 }
0x123b   :  { %736 = vmatmul.msk.f32.vlgmr.msra.gmra.mxu3 %vm110_vm5, %v652_v4 }
0x1242   :  { %v615_v59 = vpop.permute.xlu1 %614 }
0x1243   :  { %v628_v62 = vsel %vm110_vm5, %v950_v40, %v615_v59 }
0x1244   :  { %v630_v63 = vsel %vm629_vm3, %v628_v62, %v983_v35  ;;  %v746_v35 = vld [vmem:[%s1084_s5] ss:$0 sm:$0xff] }
0x124a   :  { %v622_v60 = vpop.permute.xlu1 %621 }
0x124b   :  { %v633_v1 = vsel %vm110_vm5, %v1006_v33, %v622_v60 }
0x124c   :  { %v634_v2 = vsel %vm629_vm3, %v633_v1, %v1025_v26 }
0x1252   :  { %v618_v0 = vpop.permute.xlu1 %617 }
0x1253   :  { %v632_v61 = vsel %vm631_vm4, %v630_v63, %v618_v0 }
0x1254   :  { %636 = vst [vmem:[%s1085_s6] sm:$0xff] %v632_v61 }
0x125a   :  { %v626_v3 = vpop.permute.xlu1 %625 }
0x125b   :  { %v635_v5 = vsel %vm631_vm4, %v634_v2, %v626_v3 }
0x125c   :  { %637 = vst [vmem:[%s1085_s6 + $0x8] sm:$0xff] %v635_v5 }
0x1262   :  { %v640_v40 = vpop.permute.xlu1 %639 }
0x1263   :  { %642 = vst.msk [vmem:[%s1086_s7] sm:$0xff] %vm110_vm5, %v640_v40 }
0x12be   :  { %v672_v6 = vpop.f32.mrf.mxu3 }
0x12bf   :  { %v673_v33 = vadd.f32 %v746_v35, %v672_v6 }
0x12c1   :  { %v676_v7 = vsel %vm675_vm6, %v673_v33, -inf }
0x12c2   :  { %677 = vmax.xlane.f32.xlu2 %v676_v7 }
0x1335   :  { %v678_v8 = vpop.xlane.xlu2 %677 }
0x1336   :  { %v679_v10 = vsub.f32 %v673_v33, %v678_v8 }
0x1338   :  { %v680_v12 = vmul.f32 1.442695, %v679_v10 }
0x133a   :  { %811 = vpow2.f32 %v680_v12 }
0x1340   :  { %v812_v13 = vpop.eup %811 }
0x1341   :  { %v682_v14 = vsel %vm675_vm6, %v812_v13, 0.0 }
0x1342   :  { %683 = vadd.xlane.f32.xlu0 %v682_v14 }
0x13b5   :  { %v684_v15 = vpop.xlane.xlu0 %683 }
0x13b6   :  { %813 = vrcp.f32 %v684_v15  ;;  %v696_v18 = vand.u32 2147483648, %v684_v15  ;;  %v694_v20 = vand.u32 2147483647, %v684_v15  ;;  %vm690_vm7 = vweird.f32 %v684_v15 }
0x13b8   :  { %v697_v22 = vor.u32 1.1754944e-38, %v696_v18  ;;  %vm695_vm9 = vcmp.eq.f32.partialorder %v694_v20, 8.507059e+37 }
0x13bc   :  { %v814_v41 = vpop.eup %813 }
0x13bd   :  { %v686_v16 = vmul.f32 %v814_v41, %v684_v15  ;;  %vm691_vm5 = vweird.f32 %v814_v41 }
0x13be   :  { %vm692_vm8 = vmor %vm690_vm7, %vm691_vm5 }
0x13bf   :  { %v687_v17 = vsub.f32 1.0, %v686_v16 }
0x13c1   :  { %v688_v19 = vmul.f32 %v814_v41, %v687_v17 }
0x13c3   :  { %v689_v21 = vadd.f32 %v814_v41, %v688_v19 }
0x13c5   :  { %v693_v23 = vsel %vm692_vm8, %v814_v41, %v689_v21 }
0x13c6   :  { %v698_v24 = vsel %vm695_vm9, %v697_v22, %v693_v23 }
0x13c7   :  { %v699_v25 = vmul.f32 %v812_v13, %v698_v24 }
0x13c9   :  { %700 = vst.msk [vmem:[%s1087_s8] sm:$0xff] %vm675_vm6, %v699_v25 }

</bundles_post_ra>
